<compile_context>
chip_gen: v5e
topology: v5e:2x2
jax: 0.10.0
libtpu: 0.0.40
codegen_flags: <defaults>
</compile_context>

<pallas_src>
import functools

import jax
import jax.numpy as jnp
from jax.experimental import pallas as pl
from jax.experimental.pallas import tpu as pltpu


# ----------------------------------------------------------------------------
# Hardware-derived sizing helpers
# ----------------------------------------------------------------------------
def _vmem_capacity_bytes():
    """Physical VMEM per TensorCore; fall back to the v7x minimum (64 MiB)."""
    try:
        info = pltpu.get_tpu_info()
        cap = getattr(info, "vmem_capacity_bytes", None)
        if cap:
            return int(cap)
    except Exception:
        pass
    return 64 * 1024 * 1024


def _vmem_limit(per_step_buffer_bytes):
    """Scoped VMEM limit: pipeline buffers + headroom, clamped to <= cap/2."""
    cap = _vmem_capacity_bytes()
    want = per_step_buffer_bytes + 4 * 1024 * 1024     # weights/sems/headroom
    return int(min(max(want, 16 * 1024 * 1024), cap // 2))


def _pick_batch_block(B, per_image_bytes, budget):
    """Largest divisor of B fitting the budget while keeping >= min(4,B) grid
    steps (DMA/compute overlap + v7x two-TensorCore split)."""
    divisors = [d for d in range(1, B + 1) if B % d == 0]
    fits = [d for d in divisors if d * per_image_bytes <= budget]
    min_steps = min(4, B)
    good = [d for d in fits if B // d >= min_steps]
    if good:
        return max(good)
    if fits:
        return max(fits)
    return 1


def _pick_hw_tile(HW, C, itemsize, budget):
    """Largest lane-aligned (multiple-of-128) divisor of HW whose (C, thw)
    tile fits the budget.  Returns HW if no proper aligned divisor exists."""
    aligned = [t for t in range(128, HW, 128) if HW % t == 0]
    fitting = [t for t in aligned if C * t * itemsize <= budget]
    if fitting:
        return max(fitting)
    if aligned:
        return min(aligned)
    # TODO(synk): HW has no 128-aligned proper divisor; fall back to whole
    # image per step (may exceed the budget, handled by the single-pass path).
    return HW


# ----------------------------------------------------------------------------
# Kernels
# ----------------------------------------------------------------------------
def _se_single_pass_kernel(x_ref, w1t_ref, w2t_ref, o_ref, *, inv_hw):
    # x_ref : (bb, C, HW)  NCHW with spatial flattened onto the lane axis.
    # w1t_ref: (C, Cr)   w2t_ref: (Cr, C)   -- pre-transposed fc weights.
    # Squeeze: lane reduce in f32; only the tiny (bb, C) vector is kept f32.
    pooled = jnp.sum(x_ref[...], axis=-1, dtype=jnp.float32) * inv_hw   # (bb, C)

    # Excitation: fc1 -> ReLU -> fc2 -> sigmoid (weights in native dtype).
    h = jnp.dot(pooled, w1t_ref[...], preferred_element_type=jnp.float32)
    h = jnp.maximum(h, 0.0)
    s = jnp.dot(h, w2t_ref[...], preferred_element_type=jnp.float32)
    s = jax.nn.sigmoid(s)                                               # (bb, C)

    # Scale: re-read x from VMEM, multiply in the input dtype (no full-tile
    # f32 temporary); gate broadcasts along the lane (spatial) axis.
    o_ref[...] = (x_ref[...] * s.astype(o_ref.dtype)[:, :, None]).astype(o_ref.dtype)


def _se_pool_gate_kernel(x_ref, w1t_ref, w2t_ref, s_ref, *, inv_hw):
    # grid = (B, HW // thw).  s_ref (1, C, 1) f32 doubles as the pool
    # accumulator (output block is resident across the "arbitrary" HW axis).
    hw_step = pl.program_id(1)

    @pl.when(hw_step == 0)
    def _init():
        s_ref[...] = jnp.zeros_like(s_ref)

    s_ref[...] += jnp.sum(x_ref[...], axis=-1, keepdims=True, dtype=jnp.float32)

    @pl.when(hw_step == pl.num_programs(1) - 1)
    def _finalize():
        pooled = s_ref[...][:, :, 0] * inv_hw                           # (1, C)
        h = jnp.dot(pooled, w1t_ref[...], preferred_element_type=jnp.float32)
        h = jnp.maximum(h, 0.0)
        s = jax.nn.sigmoid(jnp.dot(h, w2t_ref[...],
                                   preferred_element_type=jnp.float32))
        s_ref[...] = s[:, :, None]


def _se_scale_kernel(x_ref, s_ref, o_ref):
    # x_ref: (1, C, thw);  s_ref: (1, C, 1) f32 gate (broadcast along lanes).
    o_ref[...] = (x_ref[...] * s_ref[...].astype(x_ref.dtype)).astype(o_ref.dtype)


# ----------------------------------------------------------------------------
# Drivers
# ----------------------------------------------------------------------------
def _se_single_pass(x3, w1t, w2t, inv_hw, budget, donate_x):
    B, C, HW = x3.shape
    Cr = w1t.shape[1]
    itemsize = jnp.dtype(x3.dtype).itemsize
    per_image_bytes = C * HW * itemsize
    bb = _pick_batch_block(B, per_image_bytes, budget)
    block_bytes = bb * per_image_bytes

    kernel = functools.partial(_se_single_pass_kernel, inv_hw=inv_hw)
    return pl.pallas_call(
        kernel,
        out_shape=jax.ShapeDtypeStruct((B, C, HW), x3.dtype),
        grid_spec=pltpu.PrefetchScalarGridSpec(
            num_scalar_prefetch=0,
            grid=(B // bb,),
            in_specs=[
                # Block's last two dims (C, HW) equal the full array dims, so
                # the (8, 128) tiling rule holds for any C / HW.
                pl.BlockSpec((bb, C, HW), lambda b: (b, 0, 0)),
                # Constant index maps: weights stay VMEM-resident.
                pl.BlockSpec((C, Cr), lambda b: (0, 0)),
                pl.BlockSpec((Cr, C), lambda b: (0, 0)),
            ],
            out_specs=pl.BlockSpec((bb, C, HW), lambda b: (b, 0, 0)),
        ),
        compiler_params=pltpu.CompilerParams(
            dimension_semantics=("parallel",),
            vmem_limit_bytes=_vmem_limit(4 * block_bytes)),
        input_output_aliases={0: 0} if donate_x else {},
    )(x3, w1t, w2t)


def _se_two_pass(x3, w1t, w2t, inv_hw, thw, donate_x):
    B, C, HW = x3.shape
    Cr = w1t.shape[1]
    itemsize = jnp.dtype(x3.dtype).itemsize
    tile_bytes = C * thw * itemsize
    n_hw = HW // thw

    # Pass 1: HW-tiled pool accumulation + gate (output block is accumulator).
    gate = pl.pallas_call(
        functools.partial(_se_pool_gate_kernel, inv_hw=inv_hw),
        out_shape=jax.ShapeDtypeStruct((B, C, 1), jnp.float32),
        grid_spec=pltpu.PrefetchScalarGridSpec(
            num_scalar_prefetch=0,
            grid=(B, n_hw),
            in_specs=[
                pl.BlockSpec((1, C, thw), lambda b, h: (b, 0, h)),
                pl.BlockSpec((C, Cr), lambda b, h: (0, 0)),
                pl.BlockSpec((Cr, C), lambda b, h: (0, 0)),
            ],
            out_specs=pl.BlockSpec((1, C, 1), lambda b, h: (b, 0, 0)),
        ),
        compiler_params=pltpu.CompilerParams(
            dimension_semantics=("parallel", "arbitrary"),
            vmem_limit_bytes=_vmem_limit(2 * tile_bytes)),
    )(x3, w1t, w2t)

    # Pass 2: HW-tiled scale by the per-channel gate.
    return pl.pallas_call(
        _se_scale_kernel,
        out_shape=jax.ShapeDtypeStruct((B, C, HW), x3.dtype),
        grid_spec=pltpu.PrefetchScalarGridSpec(
            num_scalar_prefetch=0,
            grid=(B, n_hw),
            in_specs=[
                pl.BlockSpec((1, C, thw), lambda b, h: (b, 0, h)),
                pl.BlockSpec((1, C, 1), lambda b, h: (b, 0, 0)),
            ],
            out_specs=pl.BlockSpec((1, C, thw), lambda b, h: (b, 0, h)),
        ),
        compiler_params=pltpu.CompilerParams(
            dimension_semantics=("parallel", "parallel"),
            vmem_limit_bytes=_vmem_limit(4 * tile_bytes)),
        input_output_aliases={0: 0} if donate_x else {},
    )(x3, gate)


def se_layer(x, w1, w2, *, block_bytes_budget=None, donate_x=False):
    """SE forward.  x: (B, C, H, W) NCHW.
    w1: (C//r, C), w2: (C, C//r) -- PyTorch nn.Linear (out, in) layout, no bias.
    Set donate_x=True to alias x's HBM buffer to the output (caller must not
    reuse x afterwards)."""
    B, C, H, W = x.shape
    HW = H * W
    Cr = w1.shape[0]
    assert w1.shape == (Cr, C) and w2.shape == (C, Cr)

    itemsize = jnp.dtype(x.dtype).itemsize
    per_image_bytes = C * HW * itemsize
    if block_bytes_budget is None:
        # ~8 MiB blocks on 128 MiB VMEM (v5e/v6e), ~4 MiB on 64 MiB (v7x).
        block_bytes_budget = max(_vmem_capacity_bytes() // 16, 2 * 1024 * 1024)

    # No layout change: NCHW -> (B, C, HW) is a free, contiguous reshape.
    x3 = x.reshape(B, C, HW)
    # One-time tiny transpose of the fc weights so in-kernel contractions are
    # plain row x col (no per-step weight relayout).
    w1t = jnp.transpose(w1)   # (C, Cr)
    w2t = jnp.transpose(w2)   # (Cr, C)
    inv_hw = 1.0 / HW

    use_two_pass = per_image_bytes > block_bytes_budget
    thw = HW
    if use_two_pass:
        thw = _pick_hw_tile(HW, C, itemsize, block_bytes_budget)
        use_two_pass = thw < HW

    if use_two_pass:
        out3 = _se_two_pass(x3, w1t, w2t, inv_hw, thw, donate_x)
    else:
        out3 = _se_single_pass(x3, w1t, w2t, inv_hw, block_bytes_budget, donate_x)

    return out3.reshape(B, C, H, W)


# ----------------------------------------------------------------------------
# Pure-JAX reference (matches the PyTorch forward)
# ----------------------------------------------------------------------------
def se_layer_reference(x, w1, w2):
    y = jnp.mean(x.astype(jnp.float32), axis=(2, 3))         # (B, C)
    y = jnp.maximum(y @ w1.T.astype(jnp.float32), 0.0)       # (B, C//r)
    y = jax.nn.sigmoid(y @ w2.T.astype(jnp.float32))         # (B, C)
    return (x.astype(jnp.float32) * y[:, :, None, None]).astype(x.dtype)


if __name__ == "__main__":
    # Deterministic small example: B=4, C=128 (lane-dense), H=W=16, reduction=16.
    B, C, H, W = 4, 128, 16, 16
    reduction = 16
    Cr = C // reduction

    key = jax.random.PRNGKey(0)
    kx, k1, k2 = jax.random.split(key, 3)

    x = jax.random.normal(kx, (B, C, H, W), dtype=jnp.float32)
    # PyTorch Linear weights: (out_features, in_features), no bias.
    w1 = jax.random.normal(k1, (Cr, C), dtype=jnp.float32) * (1.0 / jnp.sqrt(C))
    w2 = jax.random.normal(k2, (C, Cr), dtype=jnp.float32) * (1.0 / jnp.sqrt(Cr))

    ref = se_layer_reference(x, w1, w2)

    # Single-pass (fused) path: image fits the per-block budget.
    out = jax.block_until_ready(se_layer(x, w1, w2))
    assert out.shape == (B, C, H, W)
    assert jnp.allclose(out, ref, atol=1e-5, rtol=1e-5), "single-pass mismatch"

    # HW-tiled two-pass path: force a tiny budget so one image overflows it.
    out2 = jax.block_until_ready(se_layer(x, w1, w2, block_bytes_budget=64 * 1024))
    assert jnp.allclose(out2, ref, atol=1e-5, rtol=1e-5), "two-pass mismatch"

    print("KERNEL_OK")
</pallas_src>

<mosaic_0001>
module attributes {stable_mosaic.version = 11 : i64} {
  func.func @_se_single_pass_kernel(%arg0: i32, %arg1: memref<1x128x256xf32, #tpu.memory_space<vmem>>, %arg2: memref<128x8xf32, #tpu.memory_space<vmem>>, %arg3: memref<8x128xf32, #tpu.memory_space<vmem>>, %arg4: memref<1x128x256xf32, #tpu.memory_space<vmem>>) attributes {dimension_semantics = [#tpu.dimension_semantics<parallel>], iteration_bounds = array<i64: 4>, scalar_prefetch = 0 : i64, scratch_operands = 0 : i64, tpu.core_type = #tpu.core_type<tc>, window_params = [{transform_indices = @transform_0, window_bounds = array<i64: 1, 128, 256>}, {pipeline_mode = #tpu.pipeline_mode<synchronous>, transform_indices = @transform_1, window_bounds = array<i64: 128, 8>}, {pipeline_mode = #tpu.pipeline_mode<synchronous>, transform_indices = @transform_2, window_bounds = array<i64: 8, 128>}, {transform_indices = @transform_3, window_bounds = array<i64: 1, 128, 256>}]} {
    %c0 = arith.constant 0 : index
    %c0_0 = arith.constant 0 : index
    %c0_1 = arith.constant 0 : index
    %0 = vector.load %arg1[%c0, %c0_0, %c0_1] : memref<1x128x256xf32, #tpu.memory_space<vmem>>, vector<1x128x256xf32>
    %cst = arith.constant dense<0.000000e+00> : vector<1x128xf32>
    %1 = vector.multi_reduction <add>, %0, %cst [2] : vector<1x128x256xf32> to vector<1x128xf32>
    %cst_2 = arith.constant 3.906250e-03 : f32
    %2 = vector.broadcast %cst_2 : f32 to vector<1x128xf32>
    %3 = arith.mulf %1, %2 : vector<1x128xf32>
    %c0_3 = arith.constant 0 : index
    %c0_4 = arith.constant 0 : index
    %4 = vector.load %arg2[%c0_3, %c0_4] : memref<128x8xf32, #tpu.memory_space<vmem>>, vector<128x8xf32>
    %cst_5 = arith.constant dense<0.000000e+00> : vector<1x8xf32>
    %5 = tpu.matmul %3, %4, %cst_5 {dimension_numbers = #tpu.dot_dimension_numbers<[1], [0], [0], [1], [0, 0, 1, 1], [], []>} : vector<1x128xf32>, vector<128x8xf32>, vector<1x8xf32> -> vector<1x8xf32>
    %cst_6 = arith.constant 0.000000e+00 : f32
    %6 = vector.broadcast %cst_6 : f32 to vector<1x8xf32>
    %7 = arith.maximumf %5, %6 : vector<1x8xf32>
    %c0_7 = arith.constant 0 : index
    %c0_8 = arith.constant 0 : index
    %8 = vector.load %arg3[%c0_7, %c0_8] : memref<8x128xf32, #tpu.memory_space<vmem>>, vector<8x128xf32>
    %cst_9 = arith.constant dense<0.000000e+00> : vector<1x128xf32>
    %9 = tpu.matmul %7, %8, %cst_9 {dimension_numbers = #tpu.dot_dimension_numbers<[1], [0], [0], [1], [0, 0, 1, 1], [], []>} : vector<1x8xf32>, vector<8x128xf32>, vector<1x128xf32> -> vector<1x128xf32>
    %10 = arith.negf %9 : vector<1x128xf32>
    %11 = math.exp %10 : vector<1x128xf32>
    %cst_10 = arith.constant 1.000000e+00 : f32
    %12 = vector.broadcast %cst_10 : f32 to vector<1x128xf32>
    %13 = arith.addf %12, %11 : vector<1x128xf32>
    %14 = arith.divf %12, %13 : vector<1x128xf32>
    %c0_11 = arith.constant 0 : index
    %c0_12 = arith.constant 0 : index
    %c0_13 = arith.constant 0 : index
    %15 = vector.load %arg1[%c0_11, %c0_12, %c0_13] : memref<1x128x256xf32, #tpu.memory_space<vmem>>, vector<1x128x256xf32>
    %16 = vector.shape_cast %14 : vector<1x128xf32> to vector<1x128x1xf32>
    %17 = vector.broadcast %16 : vector<1x128x1xf32> to vector<1x128x256xf32>
    %18 = arith.mulf %15, %17 : vector<1x128x256xf32>
    %c0_14 = arith.constant 0 : index
    %c0_15 = arith.constant 0 : index
    %c0_16 = arith.constant 0 : index
    %19 = vector.load %arg4[%c0_14, %c0_15, %c0_16] : memref<1x128x256xf32, #tpu.memory_space<vmem>>, vector<1x128x256xf32>
    tpu.vector_store %arg4[%c0_14, %c0_15, %c0_16], %18 {strides = array<i32>} : memref<1x128x256xf32, #tpu.memory_space<vmem>>, vector<1x128x256xf32>,
    return
  }
  func.func @transform_0(%arg0: i32) -> (i32, i32, i32) {
    %c0_i32 = arith.constant 0 : i32
    %c0_i32_0 = arith.constant 0 : i32
    %c0_i32_1 = arith.constant 0 : i32
    return %arg0, %c0_i32, %c0_i32_0 : i32, i32, i32
  }
  func.func @transform_1(%arg0: i32) -> (i32, i32) {
    %c0_i32 = arith.constant 0 : i32
    %c0_i32_0 = arith.constant 0 : i32
    %c0_i32_1 = arith.constant 0 : i32
    return %c0_i32, %c0_i32_0 : i32, i32
  }
  func.func @transform_2(%arg0: i32) -> (i32, i32) {
    %c0_i32 = arith.constant 0 : i32
    %c0_i32_0 = arith.constant 0 : i32
    %c0_i32_1 = arith.constant 0 : i32
    return %c0_i32, %c0_i32_0 : i32, i32
  }
  func.func @transform_3(%arg0: i32) -> (i32, i32, i32) {
    %c0_i32 = arith.constant 0 : i32
    %c0_i32_0 = arith.constant 0 : i32
    %c0_i32_1 = arith.constant 0 : i32
    return %arg0, %c0_i32, %c0_i32_0 : i32, i32, i32
  }
}

</mosaic_0001>

<bundles_post_ra>
// kernel: tpu_custom_call.1
= control target key start
LH: loop header
LB: loop body
LE: loop exit
PB: predicated region body
PF: predicated region fallthrough
CT: control target
= control target key end

     0   :  { %8 = vsyncpa [#allocation3], 0  ;;  %s1306_s0 = inlined_call_operand.hbm [shape: f32[4,128,256], index: 0, kind: input, shape index: {}]   ;;  %s1307_s1 = inlined_call_operand.vmem [shape: f32[128,8], index: 1, kind: input, shape index: {}]   ;;  %s1308_s2 = inlined_call_operand.vmem [shape: f32[8,128], index: 2, kind: input, shape index: {}]   ;;  %s1309_s3 = inlined_call_operand.hbm [shape: f32[4,128,256], index: 3, kind: output, shape index: {}]  }
   0x1   :  { %10 = vsyncpa [#allocation3 + $0x1], 0 }
   0x2   :  { %11 = vsyncpa [#allocation4], 0 }
   0x3   :  { %13 = vsyncpa [#allocation4 + $0x1], 0  ;;  %s909_s12 = smov 0   ;;  %s911_s13 = smov 0  }
   0x4   :  { %s913_s14 = smov 0   ;;  %s915_s15 = smov 0  }
   0x5 LB: > { %s930_s16 = sadd.s32 4294967295, %s883_s15   ;;  %s698_s17 = sadd.s32 4294967294, %s883_s15   ;;  %s883_s15 = sphi %s915_s15, %s1318_s15   ;;  %s879_s14 = sphi %s913_s14, %s1317_s14   ;;  %s875_s13 = sphi %s911_s13, %s1316_s13   ;;  %s871_s12 = sphi %s909_s12, %s1315_s12  }
   0x6   : > { %s934_s18 = sadd.s32 1, %s883_s15   ;;  %s26_s19 = sadd.s32 1, %s879_s14 }
   0x7   : > { %s23_s20 = ssub.s32 %s883_s15, %s934_s18  ;;  %p33_p0 = scmp.ne.s32.totalorder %s879_s14, %s875_s13 }
   0x8   : > { %p24_p1 = scmp.eq.s32.totalorder %s23_s20, 0  ;;  %p34_p2 = scmp.eq.s32.totalorder %s883_s15, 0 }
   0x9   : > { %p39_p3 = scmp.ne.s32.totalorder %s875_s13, %s871_s12  ;;  %p40_p4 = scmp.eq.s32.totalorder %s930_s16, 0 }
   0xa   : > { %s946_s21 = scalar_select %p24_p1, %s879_s14, %s26_s19  }
   0xb   : > { %p948_p5 = por %p34_p2, %p33_p0  ;;  %p952_p6 = por %p40_p4, %p39_p3 }
   0xc   : > { %p105_p7 = scmp.eq.s32.totalorder %s930_s16, 3  ;;  %p111_p8 = scmp.eq.s32.totalorder %s698_s17, 3 }
   0xd   : > { %p728_p9 = scmp.lt.s32.totalorder %s883_s15, 4  ;;  %s137_s26 = sand.u32 1, %s879_s14  }
   0xe   : > { %p958_p10 = por %p105_p7, %p33_p0  ;;  %p962_p11 = por %p111_p8, %p39_p3 }
   0xf   : > { %s714_s27 = sshll.u32 %s883_s15, 8  ;;  %s701_s28 = sshll.u32 %s137_s26, 8 }
  0x10   : > { %s146_s4 = scalar_lea.hbm %s1306_s0, %s714_s27  ;;  %s141_s6 = scalar_lea.vmem [#allocation2], %s701_s28 }
  0x11   : > { %s147_s5 = sshll.u32 %s146_s4, 4  ;;  %s149_s7 = sshll.u32 %s141_s6, 4  ;;  %s148_s5 = int_to_ptr.hbm [resolvable:$true] %s147_s5  ;;  %s150_s7 = int_to_ptr.vmem [resolvable:$true] %s149_s7 }
  0x12   : > { %p973_p12 = pnand %p728_p9, %p948_p5  ;;  %p704_p13 = scmp.ge.s32.totalorder %s883_s15, 1 }
  0x13   : > { %p157_p0 = scmp.lt.s32.totalorder %s883_s15, 5  ;;  %s138_s9 = scalar_lea.sflag [#allocation3], %s137_s26 }
  0x14   : > { %s787_s10 = sshra.s32 %s148_s5, 4  ;;  %p791_p2 = pneg %p973_p12  ;;  %s788_s10 = int_to_ptr.hbm [resolvable:$true] %s787_s10 }
  0x15   : > { %s789_s11 = scalar_lea.hbm %s788_s10, 256  ;;  %s794_s20 = scalar_lea.hbm %s1306_s0, 1024 }
  0x16   : > { %p790_p1 = scmp.ne.s32.totalorder %s788_s10, %s789_s11  ;;  %p795_p5 = scmp.lt.s32.totalorder %s788_s10, %s1306_s0 }
  0x17   : > { %p796_p7 = scmp.lt.s32.totalorder %s794_s20, %s789_s11 }
  0x18   : > { %p792_p3 = pnand %p791_p2, %p790_p1 }
  0x19   : > { %p797_p8 = por %p796_p7, %p795_p5 }
  0x1a   : > { %p793_p4 = pneg %p792_p3 }
  0x1c   : > { %p798_p9 = pnand %p797_p8, %p793_p4 }
  0x1e   : > { %801 = shalt.err (!%p798_p9)
}
  0x1f   : > { %s885_s26 = smov 256   ;;  %s886_s28 = smov 16  }
  0x20   : > { %723 = dma.hbm_to_vmem [thread:$0]  (!%p973_p12), %s148_s5, 4096, %s150_s7, %s138_s9, %s885_s26, %s885_s26, %s886_s28  }
  0x21   : > { %p158_p1 = pnand %p704_p13, %p157_p0 }
  0x22   : > { %s994_s29 = sand.u32 (!%p158_p1), 1, %s875_s13  }
  0x23   : > { %161 = sbr.rel (%p158_p1) target bundleno = 692 (0x2b4), region = 32  ;;  %s705_s30 = sshll.u32 (!%p158_p1), %s994_s29, 8 }
  0x24   : > { %s164_s4 = scalar_lea.sflag (!%p158_p1), [#allocation3], %s994_s29  ;;  %s1000_s6 = scalar_lea.vmem (!%p158_p1), [#allocation2], %s705_s30 }
  0x28   : > { %862 = dma.done.wait (%p952_p6), %s164_s4, 4096  }
  0x29   : > { %864 = vsyncadd (%p952_p6), %s164_s4, 4294963200  ;;  %v1007_v0 = vld [vmem:[%s1000_s6] sm:$0xff]  ;;  %v1010_v1 = vld [vmem:[%s1000_s6 + $0x8] sm:$0xff]  ;;  %v319_v59 = vlaneseq  ;;  %vm324_vm0 = vcmask 130112   ;;  %vm328_vm1 = vcmask 195712   ;;  %vm332_vm2 = vcmask 261312  }
  0x2a   : > { %v1013_v2 = vld [vmem:[%s1000_s6 + $0x20] sm:$0xff]  ;;  %v223_v3 = vadd.f32 %v1010_v1, %v1007_v0  ;;  %v1018_v4 = vld [vmem:[%s1000_s6 + $0x28] sm:$0xff]  ;;  %v1031_v9 = vld [vmem:[%s1000_s6 + $0x10] sm:$0xff]  ;;  %vm336_vm3 = vcmask 326912   ;;  %vm340_vm4 = vcmask 392512   ;;  %vm344_vm5 = vcmask 458112  }
  0x2b   : > { %v1021_v5 = vld [vmem:[%s1000_s6 + $0x40] sm:$0xff]  ;;  %v1024_v6 = vld [vmem:[%s1000_s6 + $0x48] sm:$0xff]  ;;  %v229_v7 = vadd.f32 %v1018_v4, %v1013_v2  ;;  %v1034_v10 = vld [vmem:[%s1000_s6 + $0x18] sm:$0xff]  ;;  %vm348_vm6 = vcmask 523712   ;;  %vm352_vm7 = vcmask 589312   ;;  %vm356_vm8 = vcmask 654912  }
  0x2c   : > { %v235_v8 = vadd.f32 %v1024_v6, %v1021_v5  ;;  %224 = vadd.xlane.f32.xlu0 %v223_v3  ;;  %v1037_v11 = vld [vmem:[%s1000_s6 + $0x30] sm:$0xff]  ;;  %v1040_v12 = vld [vmem:[%s1000_s6 + $0x38] sm:$0xff]  ;;  %v226_v15 = vadd.f32 %v1034_v10, %v1031_v9  ;;  %v1055_v18 = vld [vmem:[%s1000_s6 + $0x60] sm:$0xff]  ;;  %v1171_v3 = vand.u32 127, %v319_v59  ;;  %vm360_vm9 = vcmask 720512   ;;  %s1209_s7 = scalar_lea.vmem [#allocation5], %s705_s30 }
  0x2d   : > { %230 = vadd.xlane.f32.xlu1 %v229_v7  ;;  %v1043_v13 = vld [vmem:[%s1000_s6 + $0x50] sm:$0xff]  ;;  %v1046_v14 = vld [vmem:[%s1000_s6 + $0x58] sm:$0xff]  ;;  %v232_v16 = vadd.f32 %v1040_v12, %v1037_v11  ;;  %v1058_v19 = vld [vmem:[%s1000_s6 + $0x68] sm:$0xff]  ;;  %vm364_vm10 = vcmask 786112   ;;  %vm368_vm11 = vcmask 851712   ;;  %vm372_vm12 = vcmask 917312  }
  0x2e   : > { %236 = vadd.xlane.f32.xlu2 %v235_v8  ;;  %v238_v17 = vadd.f32 %v1046_v14, %v1043_v13  ;;  %v1061_v20 = vld [vmem:[%s1000_s6 + $0x70] sm:$0xff]  ;;  %v1064_v21 = vld [vmem:[%s1000_s6 + $0x78] sm:$0xff]  ;;  %v1067_v22 = vld [vmem:[%s1000_s6 + $0x80] sm:$0xff]  ;;  %v241_v24 = vadd.f32 %v1058_v19, %v1055_v18  ;;  %vm376_vm13 = vcmask 982912   ;;  %vm380_vm14 = vcmask 1048512   ;;  %s715_s30 = sshll.u32 %s930_s16, 8 }
  0x2f   : > { %v1070_v23 = vld [vmem:[%s1000_s6 + $0x88] sm:$0xff]  ;;  %v244_v25 = vadd.f32 %v1064_v21, %v1061_v20  ;;  %v1079_v27 = vld [vmem:[%s1000_s6 + $0x90] sm:$0xff]  ;;  %v1082_v28 = vld [vmem:[%s1000_s6 + $0x98] sm:$0xff]  ;;  %vm405_vm15 = vcmask 64512   ;;  %s621_s10 = scalar_lea.hbm %s1309_s3, %s715_s30  ;;  %s622_s11 = sshll.u32 %s1209_s7, 4  ;;  %s623_s11 = int_to_ptr.vmem [resolvable:$true] %s622_s11 }
  0x30   : > { %v247_v26 = vadd.f32 %v1070_v23, %v1067_v22  ;;  %v1085_v29 = vld [vmem:[%s1000_s6 + $0xa0] sm:$0xff]  ;;  %v1088_v30 = vld [vmem:[%s1000_s6 + $0xa8] sm:$0xff]  ;;  %v1091_v31 = vld [vmem:[%s1000_s6 + $0xb0] sm:$0xff]  ;;  %v250_v33 = vadd.f32 %v1082_v28, %v1079_v27  ;;  %s624_s17 = sshll.u32 %s621_s10, 4  ;;  %s610_s19 = scalar_lea.sflag [#allocation4], %s994_s29  ;;  %s625_s17 = int_to_ptr.hbm [resolvable:$true] %s624_s17 }
  0x31   : > { %v1094_v32 = vld [vmem:[%s1000_s6 + $0xb8] sm:$0xff]  ;;  %v253_v34 = vadd.f32 %v1088_v30, %v1085_v29  ;;  %v1103_v36 = vld [vmem:[%s1000_s6 + $0xc0] sm:$0xff]  ;;  %v1106_v37 = vld [vmem:[%s1000_s6 + $0xc8] sm:$0xff]  ;;  %s831_s16 = sshra.s32 %s625_s17, 4  ;;  %s837_s26 = scalar_lea.hbm %s1309_s3, 1024  ;;  %s832_s16 = int_to_ptr.hbm [resolvable:$true] %s831_s16 }
  0x32   : > { %v256_v35 = vadd.f32 %v1094_v32, %v1091_v31  ;;  %v1109_v38 = vld [vmem:[%s1000_s6 + $0xd0] sm:$0xff]  ;;  %v1112_v39 = vld [vmem:[%s1000_s6 + $0xd8] sm:$0xff]  ;;  %v1115_v40 = vld [vmem:[%s1000_s6 + $0xe0] sm:$0xff]  ;;  %v259_v42 = vadd.f32 %v1106_v37, %v1103_v36  ;;  %s833_s20 = scalar_lea.hbm %s832_s16, 256  ;;  %p838_p0 = scmp.lt.s32.totalorder %s832_s16, %s1309_s3 }
  0x33   : > { %v1118_v41 = vld [vmem:[%s1000_s6 + $0xe8] sm:$0xff]  ;;  %v262_v43 = vadd.f32 %v1112_v39, %v1109_v38  ;;  %v1127_v45 = vld [vmem:[%s1000_s6 + $0xf0] sm:$0xff]  ;;  %v1130_v46 = vld [vmem:[%s1000_s6 + $0xf8] sm:$0xff]  ;;  %p834_p6 = scmp.ne.s32.totalorder %s832_s16, %s833_s20  ;;  %p839_p2 = scmp.lt.s32.totalorder %s837_s26, %s833_s20 }
  0x34   : > { %227 = vadd.xlane.f32.xlu0 %v226_v15  ;;  %v265_v44 = vadd.f32 %v1118_v41, %v1115_v40  ;;  %v268_v47 = vadd.f32 %v1130_v46, %v1127_v45  ;;  %v302_v48 = vld [vmem:[%s1307_s1 + $0x78] sm:$0xff]  ;;  %v301_v49 = vld [vmem:[%s1307_s1 + $0x70] sm:$0xff]  ;;  %v300_v50 = vld [vmem:[%s1307_s1 + $0x68] sm:$0xff]  ;;  %v322_v15 = vadd.s32 4294967288, %v1171_v3 }
  0x35   : > { %233 = vadd.xlane.f32.xlu1 %v232_v16  ;;  %383 = vmatpush.msra.mxu0 %v302_v48  ;;  %v299_v51 = vld [vmem:[%s1307_s1 + $0x60] sm:$0xff]  ;;  %v298_v52 = vld [vmem:[%s1307_s1 + $0x58] sm:$0xff]  ;;  %v297_v53 = vld [vmem:[%s1307_s1 + $0x50] sm:$0xff]  ;;  %v326_v16 = vadd.s32 4294967280, %v1171_v3  ;;  %p835_p12 = pnand %p834_p6, %p958_p10  ;;  %p840_p3 = por %p839_p2, %p838_p0 }
  0x36   : > { %239 = vadd.xlane.f32.xlu2 %v238_v17  ;;  %v296_v54 = vld [vmem:[%s1307_s1 + $0x48] sm:$0xff]  ;;  %v295_v55 = vld [vmem:[%s1307_s1 + $0x40] sm:$0xff]  ;;  %v294_v56 = vld [vmem:[%s1307_s1 + $0x38] sm:$0xff] }
  0x37   : > { %384 = vmatpush.msra.mxu0 %v301_v49  ;;  %v293_v58 = vld [vmem:[%s1307_s1 + $0x30] sm:$0xff]  ;;  %v292_v62 = vld [vmem:[%s1307_s1 + $0x28] sm:$0xff]  ;;  %v291_v63 = vld [vmem:[%s1307_s1 + $0x20] sm:$0xff]  ;;  %p836_p13 = pneg %p835_p12 }
  0x38   : > { %v290_v7 = vld [vmem:[%s1307_s1 + $0x18] sm:$0xff]  ;;  %v287_v48 = vld [vmem:[%s1307_s1] sm:$0xff] }
  0x39   : > { %385 = vmatpush.msra.mxu0 %v300_v50  ;;  %p841_p4 = pnand %p840_p3, %p836_p13 }
  0x3b   : > { %386 = vmatpush.msra.mxu0 %v299_v51 }
  0x3c   : > { %242 = vadd.xlane.f32.xlu0 %v241_v24 }
  0x3d   : > { %245 = vadd.xlane.f32.xlu1 %v244_v25  ;;  %387 = vmatpush.msra.mxu0 %v298_v52  ;;  %v289_v25 = vld [vmem:[%s1307_s1 + $0x10] sm:$0xff]  ;;  %v334_v52 = vadd.s32 4294967264, %v1171_v3 }
  0x3e   : > { %248 = vadd.xlane.f32.xlu2 %v247_v26 }
  0x3f   : > { %388 = vmatpush.msra.mxu0 %v297_v53 }
  0x41   : > { %389 = vmatpush.msra.mxu0 %v296_v54 }
  0x43   : > { %390 = vmatpush.msra.mxu0 %v295_v55  ;;  %v338_v55 = vadd.s32 4294967256, %v1171_v3 }
  0x44   : > { %251 = vadd.xlane.f32.xlu0 %v250_v33  ;;  %v330_v33 = vadd.s32 4294967272, %v1171_v3 }
  0x45   : > { %254 = vadd.xlane.f32.xlu1 %v253_v34  ;;  %391 = vmatpush.msra.mxu0 %v294_v56 }
  0x46   : > { %257 = vadd.xlane.f32.xlu2 %v256_v35 }
  0x47   : > { %392 = vmatpush.msra.mxu0 %v293_v58 }
  0x49   : > { %393 = vmatpush.msra.mxu0 %v292_v62 }
  0x4b   : > { %394 = vmatpush.msra.mxu0 %v291_v63 }
  0x4c   : > { %260 = vadd.xlane.f32.xlu0 %v259_v42 }
  0x4d   : > { %263 = vadd.xlane.f32.xlu1 %v262_v43  ;;  %395 = vmatpush.msra.mxu0 %v290_v7  ;;  %v288_v43 = vld [vmem:[%s1307_s1 + $0x8] sm:$0xff] }
  0x4e   : > { %266 = vadd.xlane.f32.xlu2 %v265_v44 }
  0x4f   : > { %396 = vmatpush.msra.mxu0 %v289_v25  ;;  %v350_v25 = vadd.s32 4294967232, %v1171_v3 }
  0x51   : > { %397 = vmatpush.msra.mxu0 %v288_v43 }
  0x53   : > { %398 = vmatpush.msra.mxu0 %v287_v48 }
  0x54   : > { %269 = vadd.xlane.f32.xlu0 %v268_v47 }
  0x9f   : > { %v225_v57 = vpop.xlane.xlu0 %224 }
  0xa0   : > { %v231_v60 = vpop.xlane.xlu1 %230  ;;  %v271_v8 = vmul.f32 0.00390625, %v225_v57  ;;  %v342_v57 = vadd.s32 4294967248, %v1171_v3 }
  0xa1   : > { %v237_v61 = vpop.xlane.xlu2 %236  ;;  %v273_v17 = vmul.f32 0.00390625, %v231_v60 }
  0xa2   : > { %v321_v44 = vperm.slane %v271_v8, %v1171_v3  ;;  %v275_v53 = vmul.f32 0.00390625, %v237_v61 }
  0xa3   : > { %v327_v49 = vperm.slane %v273_v17, %v326_v16  ;;  %v346_v16 = vadd.s32 4294967240, %v1171_v3 }
  0xa4   : > { %v335_v8 = vperm.slane %v275_v53, %v334_v52 }
  0xa7   : > { %v228_v24 = vpop.xlane.xlu0 %227 }
  0xa8   : > { %v272_v26 = vmul.f32 0.00390625, %v228_v24  ;;  %v234_v34 = vpop.xlane.xlu1 %233 }
  0xa9   : > { %v240_v35 = vpop.xlane.xlu2 %239  ;;  %v274_v42 = vmul.f32 0.00390625, %v234_v34 }
  0xaa   : > { %v323_v47 = vperm.slane %v272_v26, %v322_v15  ;;  %v276_v56 = vmul.f32 0.00390625, %v240_v35  ;;  %v354_v35 = vadd.s32 4294967224, %v1171_v3 }
  0xab   : > { %v331_v51 = vperm.slane %v274_v42, %v330_v33 }
  0xac   : > { %v325_v50 = vsel %vm324_vm0, %v323_v47, %v321_v44  ;;  %v339_v15 = vperm.slane %v276_v56, %v338_v55 }
  0xad   : > { %v329_v54 = vsel %vm328_vm1, %v327_v49, %v325_v50  ;;  %v358_v50 = vadd.s32 4294967216, %v1171_v3 }
  0xae   : > { %v333_v60 = vsel %vm332_vm2, %v331_v51, %v329_v54  ;;  %v362_v54 = vadd.s32 4294967208, %v1171_v3 }
  0xaf   : > { %v243_v58 = vpop.xlane.xlu0 %242  ;;  %v337_v61 = vsel %vm336_vm3, %v335_v8, %v333_v60  ;;  %v366_v60 = vadd.s32 4294967200, %v1171_v3  ;;  %v370_v8 = vadd.s32 4294967192, %v1171_v3 }
  0xb0   : > { %v277_v62 = vmul.f32 0.00390625, %v243_v58  ;;  %v246_v63 = vpop.xlane.xlu1 %245  ;;  %v341_v33 = vsel %vm340_vm4, %v339_v15, %v337_v61 }
  0xb1   : > { %v249_v7 = vpop.xlane.xlu2 %248  ;;  %v278_v17 = vmul.f32 0.00390625, %v246_v63 }
  0xb2   : > { %v343_v24 = vperm.slane %v277_v62, %v342_v57  ;;  %v279_v26 = vmul.f32 0.00390625, %v249_v7 }
  0xb3   : > { %v347_v34 = vperm.slane %v278_v17, %v346_v16 }
  0xb4   : > { %v345_v42 = vsel %vm344_vm5, %v343_v24, %v341_v33  ;;  %v351_v49 = vperm.slane %v279_v26, %v350_v25  ;;  %v374_v25 = vadd.s32 4294967184, %v1171_v3 }
  0xb5   : > { %v349_v52 = vsel %vm348_vm6, %v347_v34, %v345_v42  ;;  %v378_v42 = vadd.s32 4294967176, %v1171_v3  ;;  %v450_v3 = vshrl.u32 %v319_v59, 7 }
  0xb6   : > { %v353_v56 = vsel %vm352_vm7, %v351_v49, %v349_v52  ;;  %v404_v52 = vld [vmem:[%s1308_s2] sm:$0xff] }
  0xb7   : > { %v252_v43 = vpop.xlane.xlu0 %251  ;;  %424 = vmatpush.msra.mxu1 %v404_v52  ;;  %766 = vset.pattern.permute.xlu1 %v450_v3  ;;  %v523_v52 = vadd.s32 96, %v450_v3 }
  0xb8   : > { %v280_v44 = vmul.f32 0.00390625, %v252_v43  ;;  %v255_v47 = vpop.xlane.xlu1 %254 }
  0xb9   : > { %v258_v48 = vpop.xlane.xlu2 %257  ;;  %v281_v51 = vmul.f32 0.00390625, %v255_v47 }
  0xba   : > { %v355_v53 = vperm.slane %v280_v44, %v354_v35  ;;  %v282_v55 = vmul.f32 0.00390625, %v258_v48 }
  0xbb   : > { %v359_v57 = vperm.slane %v281_v51, %v358_v50 }
  0xbc   : > { %v357_v58 = vsel %vm356_vm8, %v355_v53, %v353_v56  ;;  %v363_v63 = vperm.slane %v282_v55, %v362_v54  ;;  %v463_v55 = vadd.s32 16, %v450_v3  ;;  %v457_v56 = vadd.s32 8, %v450_v3 }
  0xbd   : > { %v361_v17 = vsel %vm360_vm9, %v359_v57, %v357_v58 }
  0xbe   : > { %v365_v33 = vsel %vm364_vm10, %v363_v63, %v361_v17  ;;  %768 = vset.pattern.permute.xlu0 %v463_v55  ;;  %767 = vset.pattern.permute.xlu2 %v457_v56 }
  0xbf   : > { %v261_v62 = vpop.xlane.xlu0 %260 }
  0xc0   : > { %v283_v7 = vmul.f32 0.00390625, %v261_v62  ;;  %v264_v15 = vpop.xlane.xlu1 %263 }
  0xc1   : > { %v267_v16 = vpop.xlane.xlu2 %266  ;;  %v284_v61 = vmul.f32 0.00390625, %v264_v15 }
  0xc2   : > { %v367_v24 = vperm.slane %v283_v7, %v366_v60  ;;  %v285_v26 = vmul.f32 0.00390625, %v267_v16 }
  0xc3   : > { %v371_v34 = vperm.slane %v284_v61, %v370_v8 }
  0xc4   : > { %v369_v35 = vsel %vm368_vm11, %v367_v24, %v365_v33  ;;  %v375_v43 = vperm.slane %v285_v26, %v374_v25  ;;  %v505_v33 = vadd.s32 72, %v450_v3 }
  0xc5   : > { %v373_v48 = vsel %vm372_vm12, %v371_v34, %v369_v35  ;;  %v469_v34 = vadd.s32 24, %v450_v3  ;;  %v475_v35 = vadd.s32 32, %v450_v3 }
  0xc6   : > { %v377_v50 = vsel %vm376_vm13, %v375_v43, %v373_v48  ;;  %v481_v43 = vadd.s32 40, %v450_v3  ;;  %v499_v48 = vadd.s32 64, %v450_v3 }
  0xc7   : > { %v270_v44 = vpop.xlane.xlu0 %269 }
  0xc8   : > { %v286_v47 = vmul.f32 0.00390625, %v270_v44  ;;  %v487_v44 = vadd.s32 48, %v450_v3 }
  0xca   : > { %v379_v49 = vperm.slane %v286_v47, %v378_v42  ;;  %v535_v42 = vadd.s32 112, %v450_v3  ;;  %v493_v47 = vadd.s32 56, %v450_v3 }
  0xcc   : > { %v381_v51 = vsel %vm380_vm14, %v379_v49, %v377_v50  ;;  %v541_v49 = vadd.s32 120, %v450_v3  ;;  %v511_v50 = vadd.s32 80, %v450_v3 }
  0xcd   : > { %399 = vmatmul.f32.vlgmr.msra.gmra.mxu0 %v381_v51  ;;  %v517_v51 = vadd.s32 88, %v450_v3 }
 0x14a   : > { %v400_v53 = vpop.f32.mrf.mxu0 }
 0x14b   : > { %v403_v54 = vmax.f32 %v400_v53, 0.0  ;;  %v529_v53 = vadd.s32 104, %v450_v3 }
 0x14d   : > { %707 = vmatmul.msk.f32.vlgmr.msra.gmra.mxu1 %vm405_vm15, %v403_v54 }
 0x1ca   : > { %v426_v57 = vpop.f32.mrf.mxu1 }
 0x1cb   : > { %v708_v58 = vmul.f32 -1.442695, %v426_v57 }
 0x1cd   : > { %783 = vpow2.f32 %v708_v58 }
 0x1d3   : > { %v784_v60 = vpop.eup %783 }
 0x1d4   : > { %v432_v62 = vadd.f32 1.0, %v784_v60 }
 0x1d6   : > { %785 = vrcp.f32 %v432_v62  ;;  %v444_v15 = vand.u32 2147483648, %v432_v62  ;;  %v442_v17 = vand.u32 2147483647, %v432_v62  ;;  %vm438_vm1 = vweird.f32 %v432_v62 }
 0x1d8   : > { %v445_v59 = vor.u32 1.1754944e-38, %v444_v15  ;;  %vm443_vm3 = vcmp.eq.f32.partialorder %v442_v17, 8.507059e+37 }
 0x1dc   : > { %v786_v63 = vpop.eup %785 }
 0x1dd   : > { %v434_v7 = vmul.f32 %v786_v63, %v432_v62  ;;  %vm439_vm0 = vweird.f32 %v786_v63 }
 0x1de   : > { %vm440_vm2 = vmor %vm438_vm1, %vm439_vm0 }
 0x1df   : > { %v435_v8 = vsub.f32 1.0, %v434_v7 }
 0x1e1   : > { %v436_v16 = vmul.f32 %v786_v63, %v435_v8 }
 0x1e3   : > { %v437_v61 = vadd.f32 %v786_v63, %v436_v16 }
 0x1e5   : > { %v441_v24 = vsel %vm440_vm2, %v786_v63, %v437_v61 }
 0x1e6   : > { %v446_v25 = vsel %vm443_vm3, %v445_v59, %v441_v24 }
 0x1e7   : > { %v448_v26 = vperm.slane %v446_v25, 0 }
 0x1e9   : > { %465 = vperm.xlu0 %768, %v448_v26   ;;  %459 = vperm.xlu2 %767, %v448_v26  }
 0x1ea   : > { %453 = vperm.xlu1 %766, %v448_v26  }
 0x1f1   : > { %775 = vset.pattern.permute.xlu0 %v505_v33  ;;  %769 = vset.pattern.permute.xlu2 %v469_v34 }
 0x1f2   : > { %770 = vset.pattern.permute.xlu1 %v475_v35 }
 0x1f9   : > { %507 = vperm.xlu0 %775, %v448_v26   ;;  %471 = vperm.xlu2 %769, %v448_v26  }
 0x1fa   : > { %477 = vperm.xlu1 %770, %v448_v26  }
 0x201   : > { %780 = vset.pattern.permute.xlu0 %v535_v42  ;;  %771 = vset.pattern.permute.xlu2 %v481_v43 }
 0x202   : > { %772 = vset.pattern.permute.xlu1 %v487_v44 }
 0x209   : > { %537 = vperm.xlu0 %780, %v448_v26   ;;  %483 = vperm.xlu2 %771, %v448_v26  }
 0x20a   : > { %489 = vperm.xlu1 %772, %v448_v26  }
 0x211   : > { %773 = vset.pattern.permute.xlu2 %v493_v47  ;;  %782 = vset.pattern.permute.xlu0 %v541_v49 }
 0x212   : > { %774 = vset.pattern.permute.xlu1 %v499_v48 }
 0x219   : > { %495 = vperm.xlu2 %773, %v448_v26  }
 0x21a   : > { %501 = vperm.xlu1 %774, %v448_v26  }
 0x221   : > { %776 = vset.pattern.permute.xlu2 %v511_v50 }
 0x222   : > { %777 = vset.pattern.permute.xlu1 %v517_v51 }
 0x229   : > { %513 = vperm.xlu2 %776, %v448_v26  }
 0x22a   : > { %519 = vperm.xlu1 %777, %v448_v26  }
 0x231   : > { %778 = vset.pattern.permute.xlu2 %v523_v52 }
 0x232   : > { %779 = vset.pattern.permute.xlu1 %v529_v53 }
 0x239   : > { %525 = vperm.xlu2 %778, %v448_v26  }
 0x23a   : > { %531 = vperm.xlu1 %779, %v448_v26  }
 0x241   : > { %781 = vset.pattern.permute.xlu2 %v541_v49 }
 0x243   : > { %v460_v54 = vpop.permute.xlu2 %459 }
 0x244   : > { %v547_v55 = vmul.f32 %v460_v54, %v1031_v9  ;;  %v548_v56 = vmul.f32 %v460_v54, %v1034_v10 }
 0x246   : > { %579 = vst [vmem:[%s1209_s7 + $0x10] sm:$0xff] %v547_v55 }
 0x247   : > { %580 = vst [vmem:[%s1209_s7 + $0x18] sm:$0xff] %v548_v56 }
 0x249   : > { %543 = vperm.xlu2 %781, %v448_v26  }
 0x253   : > { %v472_v3 = vpop.permute.xlu2 %471 }
 0x254   : > { %v551_v57 = vmul.f32 %v472_v3, %v1037_v11  ;;  %v552_v9 = vmul.f32 %v472_v3, %v1040_v12 }
 0x256   : > { %583 = vst [vmem:[%s1209_s7 + $0x30] sm:$0xff] %v551_v57 }
 0x257   : > { %584 = vst [vmem:[%s1209_s7 + $0x38] sm:$0xff] %v552_v9 }
 0x25b   : > { %v466_v10 = vpop.permute.xlu0 %465 }
 0x25c   : > { %v549_v58 = vmul.f32 %v466_v10, %v1013_v2  ;;  %v550_v60 = vmul.f32 %v466_v10, %v1018_v4  ;;  %v454_v62 = vpop.permute.xlu1 %453 }
 0x25d   : > { %v545_v63 = vmul.f32 %v454_v62, %v1007_v0  ;;  %v546_v7 = vmul.f32 %v454_v62, %v1010_v1 }
 0x25e   : > { %581 = vst [vmem:[%s1209_s7 + $0x20] sm:$0xff] %v549_v58 }
 0x25f   : > { %582 = vst [vmem:[%s1209_s7 + $0x28] sm:$0xff] %v550_v60 }
 0x260   : > { %577 = vst [vmem:[%s1209_s7] sm:$0xff] %v545_v63 }
 0x261   : > { %578 = vst [vmem:[%s1209_s7 + $0x8] sm:$0xff] %v546_v7 }
 0x263   : > { %v484_v11 = vpop.permute.xlu2 %483 }
 0x264   : > { %v555_v12 = vmul.f32 %v484_v11, %v1043_v13  ;;  %v556_v2 = vmul.f32 %v484_v11, %v1046_v14 }
 0x266   : > { %587 = vst [vmem:[%s1209_s7 + $0x50] sm:$0xff] %v555_v12 }
 0x267   : > { %588 = vst [vmem:[%s1209_s7 + $0x58] sm:$0xff] %v556_v2 }
 0x26b   : > { %v508_v0 = vpop.permute.xlu0 %507 }
 0x26c   : > { %v563_v1 = vmul.f32 %v508_v0, %v1079_v27  ;;  %v564_v4 = vmul.f32 %v508_v0, %v1082_v28  ;;  %v478_v8 = vpop.permute.xlu1 %477 }
 0x26d   : > { %v553_v15 = vmul.f32 %v478_v8, %v1021_v5  ;;  %v554_v16 = vmul.f32 %v478_v8, %v1024_v6 }
 0x26e   : > { %595 = vst [vmem:[%s1209_s7 + $0x90] sm:$0xff] %v563_v1 }
 0x26f   : > { %596 = vst [vmem:[%s1209_s7 + $0x98] sm:$0xff] %v564_v4 }
 0x270   : > { %585 = vst [vmem:[%s1209_s7 + $0x40] sm:$0xff] %v553_v15 }
 0x271   : > { %586 = vst [vmem:[%s1209_s7 + $0x48] sm:$0xff] %v554_v16 }
 0x273   : > { %v496_v13 = vpop.permute.xlu2 %495 }
 0x274   : > { %v559_v14 = vmul.f32 %v496_v13, %v1061_v20  ;;  %v560_v27 = vmul.f32 %v496_v13, %v1064_v21 }
 0x276   : > { %591 = vst [vmem:[%s1209_s7 + $0x70] sm:$0xff] %v559_v14 }
 0x277   : > { %592 = vst [vmem:[%s1209_s7 + $0x78] sm:$0xff] %v560_v27 }
 0x27b   : > { %v538_v5 = vpop.permute.xlu0 %537 }
 0x27c   : > { %v573_v6 = vmul.f32 %v538_v5, %v1115_v40  ;;  %v574_v28 = vmul.f32 %v538_v5, %v1118_v41  ;;  %v490_v17 = vpop.permute.xlu1 %489 }
 0x27d   : > { %v557_v61 = vmul.f32 %v490_v17, %v1055_v18  ;;  %v558_v59 = vmul.f32 %v490_v17, %v1058_v19 }
 0x27e   : > { %605 = vst [vmem:[%s1209_s7 + $0xe0] sm:$0xff] %v573_v6 }
 0x27f   : > { %606 = vst [vmem:[%s1209_s7 + $0xe8] sm:$0xff] %v574_v28 }
 0x280   : > { %589 = vst [vmem:[%s1209_s7 + $0x60] sm:$0xff] %v557_v61 }
 0x281   : > { %590 = vst [vmem:[%s1209_s7 + $0x68] sm:$0xff] %v558_v59 }
 0x283   : > { %v514_v20 = vpop.permute.xlu2 %513 }
 0x284   : > { %v565_v21 = vmul.f32 %v514_v20, %v1085_v29  ;;  %v566_v40 = vmul.f32 %v514_v20, %v1088_v30 }
 0x286   : > { %597 = vst [vmem:[%s1209_s7 + $0xa0] sm:$0xff] %v565_v21 }
 0x287   : > { %598 = vst [vmem:[%s1209_s7 + $0xa8] sm:$0xff] %v566_v40 }
 0x28c   : > { %v502_v41 = vpop.permute.xlu1 %501 }
 0x28d   : > { %v561_v18 = vmul.f32 %v502_v41, %v1067_v22  ;;  %v562_v19 = vmul.f32 %v502_v41, %v1070_v23 }
 0x28f   : > { %593 = vst [vmem:[%s1209_s7 + $0x80] sm:$0xff] %v561_v18 }
 0x290   : > { %594 = vst [vmem:[%s1209_s7 + $0x88] sm:$0xff] %v562_v19 }
 0x293   : > { %v526_v24 = vpop.permute.xlu2 %525 }
 0x294   : > { %v569_v25 = vmul.f32 %v526_v24, %v1103_v36  ;;  %v570_v29 = vmul.f32 %v526_v24, %v1106_v37 }
 0x296   : > { %601 = vst [vmem:[%s1209_s7 + $0xc0] sm:$0xff] %v569_v25 }
 0x297   : > { %602 = vst [vmem:[%s1209_s7 + $0xc8] sm:$0xff] %v570_v29 }
 0x29c   : > { %v520_v30 = vpop.permute.xlu1 %519 }
 0x29d   : > { %v567_v26 = vmul.f32 %v520_v30, %v1091_v31  ;;  %v568_v22 = vmul.f32 %v520_v30, %v1094_v32 }
 0x29f   : > { %599 = vst [vmem:[%s1209_s7 + $0xb0] sm:$0xff] %v567_v26 }
 0x2a0   : > { %600 = vst [vmem:[%s1209_s7 + $0xb8] sm:$0xff] %v568_v22 }
 0x2a3   : > { %v544_v23 = vpop.permute.xlu2 %543 }
 0x2a4   : > { %v575_v33 = vmul.f32 %v544_v23, %v1127_v45  ;;  %v576_v36 = vmul.f32 %v544_v23, %v1130_v46 }
 0x2a6   : > { %607 = vst [vmem:[%s1209_s7 + $0xf0] sm:$0xff] %v575_v33 }
 0x2a7   : > { %608 = vst [vmem:[%s1209_s7 + $0xf8] sm:$0xff] %v576_v36 }
 0x2ac   : > { %v532_v31 = vpop.permute.xlu1 %531 }
 0x2ad   : > { %v571_v32 = vmul.f32 %v532_v31, %v1109_v38  ;;  %v572_v37 = vmul.f32 %v532_v31, %v1112_v39 }
 0x2af   : > { %603 = vst [vmem:[%s1209_s7 + $0xd0] sm:$0xff] %v571_v32 }
 0x2b0   : > { %604 = vst [vmem:[%s1209_s7 + $0xd8] sm:$0xff] %v572_v37 }
 0x2b1   : > { %844 = shalt.err (!%p841_p4)
}
 0x2b2   : > { %s887_s29 = smov 256   ;;  %s888_s6 = smov 16  }
 0x2b3   : > { %718 = dma.vmem_to_hbm [thread:$0]  (%p958_p10), %s623_s11, 4096, %s625_s17, %s610_s19, %s887_s29, %s887_s29, %s888_s6  }
 0x2b4 PF: > { %p729_p5 = scmp.ge.s32.totalorder %s883_s15, 2  ;;  %s639_s23 = sand.u32 1, %s871_s12  }
 0x2b5   : > { %s640_s5 = scalar_lea.sflag [#allocation4], %s639_s23 }
 0x2b6   : > { %p725_p7 = pnand %p729_p5, %p962_p11 }
 0x2b8   : > { %p726_p8 = pneg %p725_p7 }
 0x2ba   : > { %866 = dma.done.wait (%p726_p8), %s640_s5, 4096  }
 0x2bb   : > { %868 = vsyncadd (%p726_p8), %s640_s5, 4294963200  ;;  %p16_p9 = scmp.ge.s32.totalorder %s934_s18, 6   ;;  %s1315_s12 = smov %s875_s13 }
 0x2bc   : > { %s1316_s13 = smov %s879_s14  ;;  %s1317_s14 = smov %s946_s21 }
 0x2bd   : > { %s1318_s15 = smov %s934_s18  ;;  %18 = sbr.rel (!%p16_p9) target bundleno = 5 (0x5), region = 77 }
 0x2c2   :  { %646 = vsyncpa [#allocation3], 1 }
 0x2c3   :  { %648 = vsyncpa [#allocation3 + $0x1], 1 }
 0x2c4   :  { %649 = vsyncpa [#allocation4], 1 }
 0x2c5   :  { %651 = vsyncpa [#allocation4 + $0x1], 1 }

</bundles_post_ra>
